<compile_context>
chip_gen: v5e
topology: v5e:2x2
jax: 0.10.0
libtpu: 0.0.40
codegen_flags: <defaults>
</compile_context>

<pallas_src>
import functools

import jax
import jax.numpy as jnp
import numpy as np
from jax.experimental import pallas as pl
from jax.experimental.pallas import tpu as pltpu

_LANES = 128
_SUB = 8
_MAX_TILE_R = 2048  # 2048 x 128 x 4B = 1 MiB per array per block


def _elem_kernel(y_ref, o_ref, w_ref, neg_ref, pos_ref, mse_ref):
    t = pl.program_id(1)

    @pl.when(t == 0)
    def _():
        pos_ref[...] = jnp.zeros_like(pos_ref)
        mse_ref[...] = jnp.zeros_like(mse_ref)

    y = y_ref[...]          # (TILE_R, 128) f32
    o = o_ref[...]
    w = w_ref[...]

    diff = o - y
    mse = diff * diff
    w_pos = w > 0.0
    # ((out > 0) > (weight > 0))  <=>  (out > 0) & ~(weight > 0)
    neg = jnp.where(jnp.logical_and(o > 0.0, jnp.logical_not(w_pos)), mse, 0.0)
    pos = jnp.where(w_pos, w * mse, 0.0)

    neg_ref[...] = neg
    pos_ref[...] += jnp.sum(pos, axis=0, keepdims=True)   # (1, 128) lane-dense partial
    mse_ref[...] += jnp.sum(mse, axis=0, keepdims=True)


def _topk_kernel(k_ref, neg_ref, acc_ref, *, tile_r, lanes):
    b = pl.program_id(0)
    t = pl.program_id(1)

    @pl.when(t == 0)
    def _():
        acc_ref[...] = jnp.zeros_like(acc_ref)

    k = k_ref[b]                                            # SMEM scalar
    r = jax.lax.broadcasted_iota(jnp.int32, (tile_r, lanes), 0)
    l = jax.lax.broadcasted_iota(jnp.int32, (tile_r, lanes), 1)
    idx = (t * tile_r + r) * lanes + l                      # global flattened position
    vals = jnp.where(idx < k, neg_ref[...], 0.0)            # prefix of the descending sort
    acc_ref[...] += jnp.sum(vals, axis=0, keepdims=True)


def swm_fpem_loss(y, out, weight, total_size, *, alpha, neg_pos_ratio):
    B, H, W, C = y.shape
    N = H * W * C

    # Tile geometry: (TILE_R, 128) blocks, TILE_R a multiple of 8.
    NR = (N + _LANES - 1) // _LANES
    NR = ((NR + _SUB - 1) // _SUB) * _SUB
    TILE_R = min(_MAX_TILE_R, NR)
    NR_pad = ((NR + TILE_R - 1) // TILE_R) * TILE_R
    N_pad = NR_pad * _LANES
    num_t = NR_pad // TILE_R

    def to_blocks(x):
        v = x.reshape(B, N).astype(jnp.float32)
        if N_pad != N:
            v = jnp.pad(v, ((0, 0), (0, N_pad - N)))
        return v.reshape(B, NR_pad, _LANES)

    yv = to_blocks(y)
    ov = to_blocks(out)
    wv = to_blocks(weight)
    ts = total_size.reshape(B).astype(jnp.float32)

    data_spec = pl.BlockSpec((None, TILE_R, _LANES), lambda b, t: (b, t, 0))
    neg_spec = pl.BlockSpec((None, TILE_R, _LANES), lambda b, t: (b, t, 0))
    acc_spec = pl.BlockSpec((None, 1, _LANES), lambda b, t: (b, 0, 0))

    cparams = pltpu.CompilerParams(
        dimension_semantics=("parallel", "arbitrary"),
        vmem_limit_bytes=32 * 1024 * 1024,
    )

    neg, pos_part, mse_part = pl.pallas_call(
        _elem_kernel,
        grid=(B, num_t),
        in_specs=[data_spec, data_spec, data_spec],
        out_specs=(neg_spec, acc_spec, acc_spec),
        out_shape=(
            jax.ShapeDtypeStruct((B, NR_pad, _LANES), jnp.float32),
            jax.ShapeDtypeStruct((B, 1, _LANES), jnp.float32),
            jax.ShapeDtypeStruct((B, 1, _LANES), jnp.float32),
        ),
        compiler_params=cparams,
        cost_estimate=pl.CostEstimate(
            flops=7 * B * N_pad,
            transcendentals=0,
            bytes_accessed=4 * B * N_pad * 4,
        ),
    )(yv, ov, wv)

    # Descending sort per batch row (torch.topk -> sum of the k largest).
    # TODO(synk): data-dependent k prevents a static lax.top_k bound; full sort retained.
    neg_sorted = -jnp.sort(-neg.reshape(B, N_pad), axis=1)
    neg_sorted = neg_sorted.reshape(B, NR_pad, _LANES)

    # k = min(int(total_size) * ratio, N)   (truncation toward zero, as .int())
    k_arr = jnp.minimum(ts.astype(jnp.int32) * neg_pos_ratio, N).astype(jnp.int32)

    topk_part = pl.pallas_call(
        functools.partial(_topk_kernel, tile_r=TILE_R, lanes=_LANES),
        grid_spec=pltpu.PrefetchScalarGridSpec(
            num_scalar_prefetch=1,
            grid=(B, num_t),
            in_specs=[pl.BlockSpec((None, TILE_R, _LANES), lambda b, t, k: (b, t, 0))],
            out_specs=pl.BlockSpec((None, 1, _LANES), lambda b, t, k: (b, 0, 0)),
        ),
        out_shape=jax.ShapeDtypeStruct((B, 1, _LANES), jnp.float32),
        compiler_params=cparams,
        cost_estimate=pl.CostEstimate(
            flops=5 * B * N_pad,
            transcendentals=0,
            bytes_accessed=B * N_pad * 4,
        ),
    )(k_arr, neg_sorted)

    # Tiny O(B) / O(B*128) final math in plain JAX.
    pos_sum = jnp.sum(pos_part.reshape(B, -1), axis=1)     # (B,)
    mse_sum = jnp.sum(mse_part.reshape(B, -1), axis=1)     # (B,)
    neg_topk = jnp.sum(topk_part.reshape(B, -1), axis=1)   # (B,)

    valid = ts > 0.0
    ts_safe = jnp.where(valid, ts, 1.0)
    per_b = jnp.where(valid, (alpha * pos_sum + neg_topk) / ts_safe, 0.0)
    train_loss = jnp.sum(per_b) / B
    mse_mean = jnp.sum(mse_sum) / (B * N)
    return (train_loss + mse_mean) * 10.0


def _reference(y, out, weight, total_size, alpha, neg_pos_ratio):
    """Pure numpy re-implementation of the PyTorch forward."""
    y = np.asarray(y, np.float32)
    out = np.asarray(out, np.float32)
    weight = np.asarray(weight, np.float32)
    ts = np.asarray(total_size, np.float32).reshape(-1)
    B, H, W, C = y.shape
    N = H * W * C
    yv = y.reshape(B, -1)
    ov = out.reshape(B, -1)
    wv = weight.reshape(B, -1)
    pos_idx = (wv > 0).astype(np.float32)
    neg_idx = ((ov > 0) & ~(wv > 0)).astype(np.float32)
    mse = (ov - yv) ** 2
    pos_loss = wv * mse * pos_idx
    neg_loss = mse * neg_idx
    train_loss = 0.0
    for b in range(B):
        if ts[b] > 0:
            k = int(min(int(ts[b]) * neg_pos_ratio, N))
            topk = np.sort(neg_loss[b])[::-1][:k].sum()
            train_loss += (alpha * pos_loss[b].sum() + topk) / ts[b]
    train_loss /= B
    return (train_loss + mse.mean()) * 10.0


if __name__ == "__main__":
    B, H, W, C = 2, 16, 16, 4
    ALPHA = 1.0
    NEG_POS_RATIO = 3

    key = jax.random.PRNGKey(0)
    k1, k2, k3 = jax.random.split(key, 3)
    y = jax.random.normal(k1, (B, H, W, C), dtype=jnp.float32)
    out = jax.random.normal(k2, (B, H, W, C), dtype=jnp.float32)
    u = jax.random.uniform(k3, (B, H, W, C), dtype=jnp.float32)
    weight = jnp.where(u > 0.7, u, 0.0)                        # sparse positive weights
    total_size = jnp.array([[5.0], [3.0]], dtype=jnp.float32)  # (B, 1)

    loss_fn = jax.jit(functools.partial(
        swm_fpem_loss, alpha=ALPHA, neg_pos_ratio=NEG_POS_RATIO))
    loss = loss_fn(y, out, weight, total_size)
    loss = jax.block_until_ready(loss)

    ref = _reference(np.array(y), np.array(out), np.array(weight),
                     np.array(total_size), ALPHA, NEG_POS_RATIO)

    np.testing.assert_allclose(np.float32(loss), np.float32(ref),
                               rtol=1e-4, atol=1e-4)
    print("KERNEL_OK")
</pallas_src>

<mosaic_0001>
module attributes {stable_mosaic.version = 11 : i64} {
  func.func @_elem_kernel(%arg0: i32, %arg1: i32, %arg2: memref<1x8x128xf32, #tpu.memory_space<vmem>>, %arg3: memref<1x8x128xf32, #tpu.memory_space<vmem>>, %arg4: memref<1x8x128xf32, #tpu.memory_space<vmem>>, %arg5: memref<1x8x128xf32, #tpu.memory_space<vmem>>, %arg6: memref<1x1x128xf32, #tpu.memory_space<vmem>>, %arg7: memref<1x1x128xf32, #tpu.memory_space<vmem>>) attributes {dimension_semantics = [#tpu.dimension_semantics<parallel>, #tpu.dimension_semantics<arbitrary>], iteration_bounds = array<i64: 2, 1>, scalar_prefetch = 0 : i64, scratch_operands = 0 : i64, tpu.core_type = #tpu.core_type<tc>, window_params = [{transform_indices = @transform_0, window_bounds = array<i64: 1, 8, 128>}, {transform_indices = @transform_1, window_bounds = array<i64: 1, 8, 128>}, {transform_indices = @transform_2, window_bounds = array<i64: 1, 8, 128>}, {transform_indices = @transform_3, window_bounds = array<i64: 1, 8, 128>}, {transform_indices = @transform_4, window_bounds = array<i64: 1, 1, 128>}, {transform_indices = @transform_5, window_bounds = array<i64: 1, 1, 128>}]} {
    %c0_i32 = arith.constant 0 : i32
    %0 = arith.cmpi eq, %arg1, %c0_i32 : i32
    %1 = arith.extui %0 : i1 to i32
    %c0_i32_0 = arith.constant 0 : i32
    %2 = arith.cmpi ne, %1, %c0_i32_0 : i32
    scf.if %2 {
      %cst_30 = arith.constant 0.000000e+00 : f32
      %41 = vector.broadcast %cst_30 : f32 to vector<1x128xf32>
      %c0_31 = arith.constant 0 : index
      %c0_32 = arith.constant 0 : index
      %c0_33 = arith.constant 0 : index
      %42 = vector.load %arg6[%c0_31, %c0_32, %c0_33] : memref<1x1x128xf32, #tpu.memory_space<vmem>>, vector<1x1x128xf32>
      %43 = vector.shape_cast %42 : vector<1x1x128xf32> to vector<1x128xf32>
      %44 = vector.shape_cast %41 : vector<1x128xf32> to vector<1x1x128xf32>
      tpu.vector_store %arg6[%c0_31, %c0_32, %c0_33], %44 {strides = array<i32>} : memref<1x1x128xf32, #tpu.memory_space<vmem>>, vector<1x1x128xf32>,
      %cst_34 = arith.constant 0.000000e+00 : f32
      %45 = vector.broadcast %cst_34 : f32 to vector<1x128xf32>
      %c0_35 = arith.constant 0 : index
      %c0_36 = arith.constant 0 : index
      %c0_37 = arith.constant 0 : index
      %46 = vector.load %arg7[%c0_35, %c0_36, %c0_37] : memref<1x1x128xf32, #tpu.memory_space<vmem>>, vector<1x1x128xf32>
      %47 = vector.shape_cast %46 : vector<1x1x128xf32> to vector<1x128xf32>
      %48 = vector.shape_cast %45 : vector<1x128xf32> to vector<1x1x128xf32>
      tpu.vector_store %arg7[%c0_35, %c0_36, %c0_37], %48 {strides = array<i32>} : memref<1x1x128xf32, #tpu.memory_space<vmem>>, vector<1x1x128xf32>,
    } else {
    }
    %c0 = arith.constant 0 : index
    %c0_1 = arith.constant 0 : index
    %c0_2 = arith.constant 0 : index
    %3 = vector.load %arg2[%c0, %c0_1, %c0_2] : memref<1x8x128xf32, #tpu.memory_space<vmem>>, vector<1x8x128xf32>
    %4 = vector.shape_cast %3 : vector<1x8x128xf32> to vector<8x128xf32>
    %c0_3 = arith.constant 0 : index
    %c0_4 = arith.constant 0 : index
    %c0_5 = arith.constant 0 : index
    %5 = vector.load %arg3[%c0_3, %c0_4, %c0_5] : memref<1x8x128xf32, #tpu.memory_space<vmem>>, vector<1x8x128xf32>
    %6 = vector.shape_cast %5 : vector<1x8x128xf32> to vector<8x128xf32>
    %c0_6 = arith.constant 0 : index
    %c0_7 = arith.constant 0 : index
    %c0_8 = arith.constant 0 : index
    %7 = vector.load %arg4[%c0_6, %c0_7, %c0_8] : memref<1x8x128xf32, #tpu.memory_space<vmem>>, vector<1x8x128xf32>
    %8 = vector.shape_cast %7 : vector<1x8x128xf32> to vector<8x128xf32>
    %9 = arith.subf %6, %4 : vector<8x128xf32>
    %10 = arith.mulf %9, %9 : vector<8x128xf32>
    %cst = arith.constant 0.000000e+00 : f32
    %11 = vector.broadcast %cst : f32 to vector<8x128xf32>
    %12 = arith.cmpf ogt, %8, %11 : vector<8x128xf32>
    %cst_9 = arith.constant 0.000000e+00 : f32
    %13 = vector.broadcast %cst_9 : f32 to vector<8x128xf32>
    %14 = arith.cmpf ogt, %6, %13 : vector<8x128xf32>
    %cst_10 = arith.constant dense<true> : vector<8x128xi1>
    %15 = arith.xori %12, %cst_10 : vector<8x128xi1>
    %16 = arith.andi %14, %15 : vector<8x128xi1>
    %cst_11 = arith.constant 0.000000e+00 : f32
    %17 = vector.broadcast %cst_11 : f32 to vector<8x128xf32>
    %18 = arith.select %16, %10, %17 : vector<8x128xi1>, vector<8x128xf32>
    %19 = arith.mulf %8, %10 : vector<8x128xf32>
    %cst_12 = arith.constant 0.000000e+00 : f32
    %20 = vector.broadcast %cst_12 : f32 to vector<8x128xf32>
    %21 = arith.select %12, %19, %20 : vector<8x128xi1>, vector<8x128xf32>
    %c0_13 = arith.constant 0 : index
    %c0_14 = arith.constant 0 : index
    %c0_15 = arith.constant 0 : index
    %22 = vector.load %arg5[%c0_13, %c0_14, %c0_15] : memref<1x8x128xf32, #tpu.memory_space<vmem>>, vector<1x8x128xf32>
    %23 = vector.shape_cast %22 : vector<1x8x128xf32> to vector<8x128xf32>
    %24 = vector.shape_cast %18 : vector<8x128xf32> to vector<1x8x128xf32>
    tpu.vector_store %arg5[%c0_13, %c0_14, %c0_15], %24 {strides = array<i32>} : memref<1x8x128xf32, #tpu.memory_space<vmem>>, vector<1x8x128xf32>,
    %c0_16 = arith.constant 0 : index
    %c0_17 = arith.constant 0 : index
    %c0_18 = arith.constant 0 : index
    %25 = vector.load %arg6[%c0_16, %c0_17, %c0_18] : memref<1x1x128xf32, #tpu.memory_space<vmem>>, vector<1x1x128xf32>
    %26 = vector.shape_cast %25 : vector<1x1x128xf32> to vector<1x128xf32>
    %cst_19 = arith.constant dense<0.000000e+00> : vector<128xf32>
    %27 = vector.multi_reduction <add>, %21, %cst_19 [0] : vector<8x128xf32> to vector<128xf32>
    %28 = vector.shape_cast %27 : vector<128xf32> to vector<1x128xf32>
    %29 = arith.addf %26, %28 : vector<1x128xf32>
    %c0_20 = arith.constant 0 : index
    %c0_21 = arith.constant 0 : index
    %c0_22 = arith.constant 0 : index
    %30 = vector.load %arg6[%c0_20, %c0_21, %c0_22] : memref<1x1x128xf32, #tpu.memory_space<vmem>>, vector<1x1x128xf32>
    %31 = vector.shape_cast %30 : vector<1x1x128xf32> to vector<1x128xf32>
    %32 = vector.shape_cast %29 : vector<1x128xf32> to vector<1x1x128xf32>
    tpu.vector_store %arg6[%c0_20, %c0_21, %c0_22], %32 {strides = array<i32>} : memref<1x1x128xf32, #tpu.memory_space<vmem>>, vector<1x1x128xf32>,
    %c0_23 = arith.constant 0 : index
    %c0_24 = arith.constant 0 : index
    %c0_25 = arith.constant 0 : index
    %33 = vector.load %arg7[%c0_23, %c0_24, %c0_25] : memref<1x1x128xf32, #tpu.memory_space<vmem>>, vector<1x1x128xf32>
    %34 = vector.shape_cast %33 : vector<1x1x128xf32> to vector<1x128xf32>
    %cst_26 = arith.constant dense<0.000000e+00> : vector<128xf32>
    %35 = vector.multi_reduction <add>, %10, %cst_26 [0] : vector<8x128xf32> to vector<128xf32>
    %36 = vector.shape_cast %35 : vector<128xf32> to vector<1x128xf32>
    %37 = arith.addf %34, %36 : vector<1x128xf32>
    %c0_27 = arith.constant 0 : index
    %c0_28 = arith.constant 0 : index
    %c0_29 = arith.constant 0 : index
    %38 = vector.load %arg7[%c0_27, %c0_28, %c0_29] : memref<1x1x128xf32, #tpu.memory_space<vmem>>, vector<1x1x128xf32>
    %39 = vector.shape_cast %38 : vector<1x1x128xf32> to vector<1x128xf32>
    %40 = vector.shape_cast %37 : vector<1x128xf32> to vector<1x1x128xf32>
    tpu.vector_store %arg7[%c0_27, %c0_28, %c0_29], %40 {strides = array<i32>} : memref<1x1x128xf32, #tpu.memory_space<vmem>>, vector<1x1x128xf32>,
    return
  }
  func.func @transform_0(%arg0: i32, %arg1: i32) -> (i32, i32, i32) {
    %c0_i32 = arith.constant 0 : i32
    %c0_i32_0 = arith.constant 0 : i32
    return %arg0, %arg1, %c0_i32 : i32, i32, i32
  }
  func.func @transform_1(%arg0: i32, %arg1: i32) -> (i32, i32, i32) {
    %c0_i32 = arith.constant 0 : i32
    %c0_i32_0 = arith.constant 0 : i32
    return %arg0, %arg1, %c0_i32 : i32, i32, i32
  }
  func.func @transform_2(%arg0: i32, %arg1: i32) -> (i32, i32, i32) {
    %c0_i32 = arith.constant 0 : i32
    %c0_i32_0 = arith.constant 0 : i32
    return %arg0, %arg1, %c0_i32 : i32, i32, i32
  }
  func.func @transform_3(%arg0: i32, %arg1: i32) -> (i32, i32, i32) {
    %c0_i32 = arith.constant 0 : i32
    %c0_i32_0 = arith.constant 0 : i32
    return %arg0, %arg1, %c0_i32 : i32, i32, i32
  }
  func.func @transform_4(%arg0: i32, %arg1: i32) -> (i32, i32, i32) {
    %c0_i32 = arith.constant 0 : i32
    %c0_i32_0 = arith.constant 0 : i32
    %c0_i32_1 = arith.constant 0 : i32
    return %arg0, %c0_i32, %c0_i32_0 : i32, i32, i32
  }
  func.func @transform_5(%arg0: i32, %arg1: i32) -> (i32, i32, i32) {
    %c0_i32 = arith.constant 0 : i32
    %c0_i32_0 = arith.constant 0 : i32
    %c0_i32_1 = arith.constant 0 : i32
    return %arg0, %c0_i32, %c0_i32_0 : i32, i32, i32
  }
}

module attributes {stable_mosaic.version = 11 : i64} {
  func.func @_topk_kernel(%arg0: i32, %arg1: i32, %arg2: memref<2xi32, #tpu.memory_space<smem>>, %arg3: memref<1x8x128xf32, #tpu.memory_space<vmem>>, %arg4: memref<1x1x128xf32, #tpu.memory_space<vmem>>) attributes {dimension_semantics = [#tpu.dimension_semantics<parallel>, #tpu.dimension_semantics<arbitrary>], iteration_bounds = array<i64: 2, 1>, scalar_prefetch = 1 : i64, scratch_operands = 0 : i64, tpu.core_type = #tpu.core_type<tc>, window_params = [{transform_indices = @transform_0, window_bounds = array<i64: 1, 8, 128>}, {transform_indices = @transform_1, window_bounds = array<i64: 1, 1, 128>}]} {
    %c0_i32 = arith.constant 0 : i32
    %0 = arith.cmpi eq, %arg1, %c0_i32 : i32
    %1 = arith.extui %0 : i1 to i32
    %c0_i32_0 = arith.constant 0 : i32
    %2 = arith.cmpi ne, %1, %c0_i32_0 : i32
    scf.if %2 {
      %cst_10 = arith.constant 0.000000e+00 : f32
      %27 = vector.broadcast %cst_10 : f32 to vector<1x128xf32>
      %c0_11 = arith.constant 0 : index
      %c0_12 = arith.constant 0 : index
      %c0_13 = arith.constant 0 : index
      %28 = vector.load %arg4[%c0_11, %c0_12, %c0_13] : memref<1x1x128xf32, #tpu.memory_space<vmem>>, vector<1x1x128xf32>
      %29 = vector.shape_cast %28 : vector<1x1x128xf32> to vector<1x128xf32>
      %30 = vector.shape_cast %27 : vector<1x128xf32> to vector<1x1x128xf32>
      tpu.vector_store %arg4[%c0_11, %c0_12, %c0_13], %30 {strides = array<i32>} : memref<1x1x128xf32, #tpu.memory_space<vmem>>, vector<1x1x128xf32>,
    } else {
    }
    %3 = arith.index_cast %arg0 : i32 to index
    %4 = memref.load %arg2[%3] : memref<2xi32, #tpu.memory_space<smem>>
    %5 = tpu.iota {dimensions = array<i32: 0>} : vector<8x128xi32>
    %6 = tpu.iota {dimensions = array<i32: 1>} : vector<8x128xi32>
    %c8_i32 = arith.constant 8 : i32
    %7 = arith.muli %arg1, %c8_i32 : i32
    %8 = vector.broadcast %7 : i32 to vector<8x128xi32>
    %9 = arith.addi %8, %5 : vector<8x128xi32>
    %c128_i32 = arith.constant 128 : i32
    %10 = vector.broadcast %c128_i32 : i32 to vector<8x128xi32>
    %11 = arith.muli %9, %10 : vector<8x128xi32>
    %12 = arith.addi %11, %6 : vector<8x128xi32>
    %13 = vector.broadcast %4 : i32 to vector<8x128xi32>
    %14 = arith.cmpi slt, %12, %13 : vector<8x128xi32>
    %c0 = arith.constant 0 : index
    %c0_1 = arith.constant 0 : index
    %c0_2 = arith.constant 0 : index
    %15 = vector.load %arg3[%c0, %c0_1, %c0_2] : memref<1x8x128xf32, #tpu.memory_space<vmem>>, vector<1x8x128xf32>
    %16 = vector.shape_cast %15 : vector<1x8x128xf32> to vector<8x128xf32>
    %cst = arith.constant 0.000000e+00 : f32
    %17 = vector.broadcast %cst : f32 to vector<8x128xf32>
    %18 = arith.select %14, %16, %17 : vector<8x128xi1>, vector<8x128xf32>
    %c0_3 = arith.constant 0 : index
    %c0_4 = arith.constant 0 : index
    %c0_5 = arith.constant 0 : index
    %19 = vector.load %arg4[%c0_3, %c0_4, %c0_5] : memref<1x1x128xf32, #tpu.memory_space<vmem>>, vector<1x1x128xf32>
    %20 = vector.shape_cast %19 : vector<1x1x128xf32> to vector<1x128xf32>
    %cst_6 = arith.constant dense<0.000000e+00> : vector<128xf32>
    %21 = vector.multi_reduction <add>, %18, %cst_6 [0] : vector<8x128xf32> to vector<128xf32>
    %22 = vector.shape_cast %21 : vector<128xf32> to vector<1x128xf32>
    %23 = arith.addf %20, %22 : vector<1x128xf32>
    %c0_7 = arith.constant 0 : index
    %c0_8 = arith.constant 0 : index
    %c0_9 = arith.constant 0 : index
    %24 = vector.load %arg4[%c0_7, %c0_8, %c0_9] : memref<1x1x128xf32, #tpu.memory_space<vmem>>, vector<1x1x128xf32>
    %25 = vector.shape_cast %24 : vector<1x1x128xf32> to vector<1x128xf32>
    %26 = vector.shape_cast %23 : vector<1x128xf32> to vector<1x1x128xf32>
    tpu.vector_store %arg4[%c0_7, %c0_8, %c0_9], %26 {strides = array<i32>} : memref<1x1x128xf32, #tpu.memory_space<vmem>>, vector<1x1x128xf32>,
    return
  }
  func.func @transform_0(%arg0: i32, %arg1: i32, %arg2: memref<2xi32, #tpu.memory_space<smem>>) -> (i32, i32, i32) {
    %c0_i32 = arith.constant 0 : i32
    %c0_i32_0 = arith.constant 0 : i32
    return %arg0, %arg1, %c0_i32 : i32, i32, i32
  }
  func.func @transform_1(%arg0: i32, %arg1: i32, %arg2: memref<2xi32, #tpu.memory_space<smem>>) -> (i32, i32, i32) {
    %c0_i32 = arith.constant 0 : i32
    %c0_i32_0 = arith.constant 0 : i32
    %c0_i32_1 = arith.constant 0 : i32
    return %arg0, %c0_i32, %c0_i32_0 : i32, i32, i32
  }
}

</mosaic_0001>

<bundles_post_ra>
// kernel: swm_fpem_loss.2
= control target key start
LH: loop header
LB: loop body
LE: loop exit
PB: predicated region body
PF: predicated region fallthrough
CT: control target
= control target key end

     0   :  { %s608_s18 = smov 0   ;;  %s610_s19 = smov 0   ;;  %s663_s0 = inlined_call_operand.vmem [shape: f32[2,8,128], index: 0, kind: input, shape index: {}]   ;;  %s664_s1 = inlined_call_operand.vmem [shape: f32[2,8,128], index: 1, kind: input, shape index: {}]   ;;  %s665_s2 = inlined_call_operand.vmem [shape: f32[2,8,128], index: 2, kind: input, shape index: {}]   ;;  %s666_s3 = inlined_call_operand.vmem [shape: f32[2,8,128], index: 3, kind: output, shape index: {0}]   ;;  %s667_s4 = inlined_call_operand.vmem [shape: f32[2,1,128], index: 4, kind: output, shape index: {1}]   ;;  %s668_s5 = inlined_call_operand.vmem [shape: f32[2,1,128], index: 5, kind: output, shape index: {2}]  }
   0x1   :  { %s612_s20 = smov 0  }
   0x2 LB: > { %s28_s21 = sadd.s32 1, %s570_s19  ;;  %p519_p0 = scmp.ge.s32.totalorder %s574_s20, 1  ;;  %s574_s20 = sphi %s612_s20, %s16_s20   ;;  %s570_s19 = sphi %s610_s19, %s670_s19   ;;  %s566_s18 = sphi %s608_s18, %s669_s18  }
   0x3   : > { %p30_p1 = scmp.ge.s32.totalorder %s28_s21, 2  ;;  %p238_p2 = scmp.lt.s32.totalorder %s574_s20, 3 }
   0x5   : > { %s672_s21 = smov (%p30_p1, %s28_s21), 0  ;;  %p239_p3 = pnand %p519_p0, %p238_p2 }
   0x6   : > { %p290_p4 = scmp.lt.s32.totalorder (!%p239_p3), %s566_s18, 1 }
   0x7   : > { %242 = sbr.rel (%p239_p3) target bundleno = 40 (0x28), region = 32 }
   0xc   : > { %s674_s18 = smov (!%p290_p4, %s566_s18), 1  ;;  %v576_v0 = vmov 0.0   ;;  %vm577_vm2 = vmmov 1  }
   0xd   : > { %s629_s24 = scalar_lea.vmem %s667_s4, %s674_s18  ;;  %s634_s27 = scalar_lea.vmem %s668_s5, %s674_s18 }
   0xe   : > { %328 = vst [vmem:[%s629_s24] sm:$0x1] %v576_v0  ;;  %s520_s28 = sshll.u32 %s674_s18, 3 }
   0xf   : > { %329 = vst [vmem:[%s634_s27] sm:$0x1] %v576_v0  ;;  %s296_s6 = scalar_lea.vmem %s663_s0, %s520_s28  ;;  %s303_s9 = scalar_lea.vmem %s664_s1, %s520_s28 }
  0x10   : > { %s310_s12 = scalar_lea.vmem %s665_s2, %s520_s28  ;;  %v330_v1 = vld [vmem:[%s296_s6] sm:$0xff]  ;;  %s317_s15 = scalar_lea.vmem %s666_s3, %s520_s28 }
  0x11   : > { %v331_v2 = vld [vmem:[%s303_s9] sm:$0xff] }
  0x12   : > { %v332_v3 = vld [vmem:[%s310_s12] sm:$0xff]  ;;  %v333_v4 = vsub.f32 %v331_v2, %v330_v1  ;;  %vm336_vm0 = vcmp.gt.f32.partialorder %v331_v2, 0.0 }
  0x13   : > { %vm335_vm1 = vcmp.gt.f32.partialorder %v332_v3, 0.0 }
  0x14   : > { %v334_v5 = vmul.f32 %v333_v4, %v333_v4  ;;  %vm337_vm3 = vmxor %vm335_vm1, %vm577_vm2 }
  0x15   : > { %vm338_vm4 = vmand %vm336_vm0, %vm337_vm3  ;;  %v343_v21 = vld [vmem:[%s629_s24] sm:$0x1] }
  0x16   : > { %v339_v6 = vsel %vm338_vm4, %v334_v5, 0.0  ;;  %v340_v7 = vmul.f32 %v334_v5, %v332_v3  ;;  %v353_v8 = vrot.slane %v334_v5, 4  ;;  %v352_v18 = vld [vmem:[%s634_s27] sm:$0x1] }
  0x17   : > { %342 = vst [vmem:[%s317_s15] sm:$0xff] %v339_v6 }
  0x18   : > { %v341_v9 = vsel %vm335_vm1, %v340_v7, 0.0  ;;  %v354_v10 = vadd.f32 %v353_v8, %v334_v5 }
  0x19   : > { %v344_v11 = vrot.slane %v341_v9, 4 }
  0x1a   : > { %v355_v12 = vrot.slane %v354_v10, 2 }
  0x1b   : > { %v345_v13 = vadd.f32 %v344_v11, %v341_v9 }
  0x1c   : > { %v356_v14 = vadd.f32 %v355_v12, %v354_v10 }
  0x1d   : > { %v346_v15 = vrot.slane %v345_v13, 2 }
  0x1e   : > { %v357_v16 = vrot.slane %v356_v14, 1 }
  0x1f   : > { %v347_v17 = vadd.f32 %v346_v15, %v345_v13 }
  0x20   : > { %v358_v19 = vadd.f32 %v357_v16, %v356_v14 }
  0x21   : > { %v348_v20 = vrot.slane %v347_v17, 1 }
  0x22   : > { %v359_v22 = vadd.f32 %v358_v19, %v352_v18 }
  0x23   : > { %v349_v23 = vadd.f32 %v348_v20, %v347_v17 }
  0x24   : > { %360 = vst [vmem:[%s634_s27] sm:$0x1] %v359_v22 }
  0x25   : > { %v350_v24 = vadd.f32 %v349_v23, %v343_v21 }
  0x27   : > { %351 = vst [vmem:[%s629_s24] sm:$0x1] %v350_v24 }
  0x28 PF: > { %s16_s20 = sadd.s32 1, %s574_s20   ;;  %s669_s18 = smov %s570_s19 }
  0x29   : > { %p13_p5 = scmp.ge.s32.totalorder %s16_s20, 4   ;;  %s670_s19 = smov %s672_s21 }
  0x2b   :  { %15 = sbr.rel (!%p13_p5) target bundleno = 2 (0x2), region = 96 }

// kernel: swm_fpem_loss.3
= control target key start
LH: loop header
LB: loop body
LE: loop exit
PB: predicated region body
PF: predicated region fallthrough
CT: control target
= control target key end

     0   :  { %s300_s12 = smov [#allocation3]   ;;  %s353_s0 = inlined_call_operand.vmem [shape: s32[2], index: 0, kind: input, shape index: {}]   ;;  %s354_s1 = inlined_call_operand.vmem [shape: f32[2,8,128], index: 1, kind: input, shape index: {}]   ;;  %s355_s2 = inlined_call_operand.vmem [shape: f32[2,1,128], index: 2, kind: output, shape index: {}]  }
   0x1   :  { %s8_s11 = sshll.u32 %s353_s0, 4  ;;  %s9_s11 = int_to_ptr.vmem [resolvable:$true] %s8_s11 }
   0x2   :  { %11 = dma.vmem_to_smem %s9_s11, 16, %s300_s12, [#allocation2] }
   0x3   :  { %286 = dma.done.wait [#allocation2], 16 }
   0x4   :  { %287 = vsyncadd [#allocation2], 4294967280 }
   0x5   :  { %14 = sfence }
   0x6   :  { %s320_s13 = smov 0   ;;  %s322_s14 = smov 0  }
   0x7   :  { %s324_s15 = smov 0  }
   0x8 LB: > { %s32_s0 = sadd.s32 1, %s294_s14  ;;  %p232_p0 = scmp.ge.s32.totalorder %s298_s15, 1  ;;  %s298_s15 = sphi %s324_s15, %s20_s15   ;;  %s294_s14 = sphi %s322_s14, %s357_s14   ;;  %s290_s13 = sphi %s320_s13, %s356_s13  }
   0x9   : > { %p34_p1 = scmp.ge.s32.totalorder %s32_s0, 2  ;;  %p112_p2 = scmp.lt.s32.totalorder %s298_s15, 3 }
   0xb   : > { %s359_s0 = smov (%p34_p1, %s32_s0), 0  ;;  %p113_p3 = pnand %p232_p0, %p112_p2 }
   0xc   : > { %p132_p4 = scmp.lt.s32.totalorder (!%p113_p3), %s290_s13, 1  ;;  %s147_s16 = sld [smem:[#allocation3 + %s290_s13]] (!%p113_p3) }
   0xd   : > { %116 = sbr.rel (%p113_p3) target bundleno = 43 (0x2b), region = 24 }
  0x12   : > { %v148_v0 = vlaneseq  ;;  %s361_s13 = smov (!%p132_p4, %s290_s13), 1  ;;  %v301_v4 = vmov 0.0   ;;  %v157_v6 = vstv %s147_s16 }
  0x13   : > { %s233_s17 = sshll.u32 %s361_s13, 3  ;;  %s141_s20 = scalar_lea.vmem %s355_s2, %s361_s13 }
  0x14   : > { %v149_v1 = vshrl.u32 %v148_v0, 7  ;;  %v151_v2 = vand.u32 127, %v148_v0  ;;  %s138_s23 = scalar_lea.vmem %s354_s1, %s233_s17  ;;  %146 = vst [vmem:[%s141_s20] sm:$0x1] %v301_v4 }
  0x15   : > { %v159_v7 = vld [vmem:[%s138_s23] sm:$0xff] }
  0x16   : > { %v155_v3 = vmul.u32 128, %v149_v1 }
  0x18   : > { %v156_v5 = vadd.s32 %v155_v3, %v151_v2 }
  0x1a   : > { %vm158_vm0 = vcmp.lt.s32.totalorder %v156_v5, %v157_v6 }
  0x1b   : > { %v160_v8 = vsel %vm158_vm0, %v159_v7, 0.0  ;;  %v161_v14 = vld [vmem:[%s141_s20] sm:$0x1] }
  0x1c   : > { %v162_v9 = vrot.slane %v160_v8, 4 }
  0x1e   : > { %v163_v10 = vadd.f32 %v162_v9, %v160_v8 }
  0x20   : > { %v164_v11 = vrot.slane %v163_v10, 2 }
  0x22   : > { %v165_v12 = vadd.f32 %v164_v11, %v163_v10 }
  0x24   : > { %v166_v13 = vrot.slane %v165_v12, 1 }
  0x26   : > { %v167_v15 = vadd.f32 %v166_v13, %v165_v12 }
  0x28   : > { %v168_v16 = vadd.f32 %v167_v15, %v161_v14 }
  0x2a   : > { %169 = vst [vmem:[%s141_s20] sm:$0x1] %v168_v16 }
  0x2b PF: > { %s20_s15 = sadd.s32 1, %s298_s15   ;;  %s356_s13 = smov %s294_s14 }
  0x2c   : > { %p17_p5 = scmp.ge.s32.totalorder %s20_s15, 4   ;;  %s357_s14 = smov %s359_s0 }
  0x2e   :  { %19 = sbr.rel (!%p17_p5) target bundleno = 8 (0x8), region = 58 }

</bundles_post_ra>
